<compile_context>
chip_gen: v5e
topology: v5e:2x2
jax: 0.10.0
libtpu: 0.0.40
codegen_flags: <defaults>
</compile_context>

<pallas_src>
import functools
import math

import jax
import jax.numpy as jnp
from jax.experimental import pallas as pl
from jax.experimental.pallas import tpu as pltpu


# Fits v7x's 64 MiB physical VMEM with headroom; plenty below v5e/v6e's 128 MiB.
_VMEM_LIMIT = 48 * 1024 * 1024


def _tile(dim, target, align):
    """Largest tile <= target that divides dim and respects `align` (else full dim)."""
    if dim <= target:
        return dim
    t = (target // align) * align
    while t >= align:
        if dim % t == 0:
            return t
        t -= align
    return dim


# -------------------- kernel 1: fused Q/K/V projection ---------------------- #

def _proj_kernel(x_ref, w_ref, b_ref, o_ref, acc_ref):
    @pl.when(pl.program_id(3) == 0)
    def _():
        acc_ref[...] = jnp.zeros_like(acc_ref)

    acc_ref[...] += jnp.dot(x_ref[0], w_ref[0], preferred_element_type=jnp.float32)

    @pl.when(pl.program_id(3) == pl.num_programs(3) - 1)
    def _():
        o_ref[0] = (acc_ref[...] + b_ref[0]).astype(o_ref.dtype)


def fused_qkv_projection(x3, w3_t, b3, *, tm=512, tn=512, tk=512):
    """x3: (3, M, K) bf16, w3_t: (3, K, F) bf16, b3: (3, 1, F) f32 -> (3, M, F) bf16."""
    p, m, kdim = x3.shape
    f = w3_t.shape[-1]
    tm, tn, tk = _tile(m, tm, 8), _tile(f, tn, 128), _tile(kdim, tk, 128)
    grid = (p, m // tm, f // tn, kdim // tk)
    return pl.pallas_call(
        _proj_kernel,
        grid=grid,
        in_specs=[
            pl.BlockSpec((1, tm, tk), lambda pp, i, j, kk: (pp, i, kk)),
            pl.BlockSpec((1, tk, tn), lambda pp, i, j, kk: (pp, kk, j)),
            pl.BlockSpec((1, 1, tn), lambda pp, i, j, kk: (pp, 0, j)),
        ],
        out_specs=pl.BlockSpec((1, tm, tn), lambda pp, i, j, kk: (pp, i, j)),
        out_shape=jax.ShapeDtypeStruct((p, m, f), jnp.bfloat16),
        scratch_shapes=[pltpu.VMEM((tm, tn), jnp.float32)],
        compiler_params=pltpu.CompilerParams(
            dimension_semantics=("parallel", "parallel", "parallel", "arbitrary"),
            vmem_limit_bytes=_VMEM_LIMIT,
        ),
    )(x3, w3_t, b3)


# ---------- kernel 2: chunked attention + head-mean weights + out-proj ------ #

def _attn_kernel(qkv_ref, wo_ref, bo_ref, y_ref, w_ref, *,
                 batch, heads, groups, head_dim, cb):
    G, H, D, N = groups, heads, head_dim, batch
    E = H * D
    NH = N * H
    NE = N * E
    scale = 1.0 / math.sqrt(D)

    q = qkv_ref[0]                                     # (cb, G, NE) bf16
    k = qkv_ref[1]
    v = qkv_ref[2]

    # Block-diagonal expansion: row j = (n*H + h)*G + g' of k2/v2 carries key /
    # value g' of (batch n, head h) on lanes [(n*H+h)*D, (n*H+h+1)*D), zeros
    # elsewhere.  Keeps the lane dimension dense (NE / NH*G wide) and removes
    # every head-split / head-merge transpose.
    row_grp = jax.lax.broadcasted_iota(jnp.int32, (NH * G, NE), 0) // G
    col_grp = jax.lax.broadcasted_iota(jnp.int32, (NH * G, NE), 1) // D
    blk_mask = (row_grp == col_grp).astype(q.dtype)    # (NH*G, NE)

    k2 = jnp.tile(k, (1, NH, 1)) * blk_mask            # (cb, NH*G, NE)
    v2 = jnp.tile(v, (1, NH, 1)) * blk_mask

    # Scores for all (batch, head) pairs at once (lane-dense last dim NH*G).
    s = jnp.einsum("cgx,cjx->cgj", q, k2,
                   preferred_element_type=jnp.float32) * scale   # (cb, G, NH*G)

    # Per-(batch, head) softmax over the G keys inside each lane group.
    s4 = s.reshape(cb, G, NH, G)
    m = jnp.max(s4, axis=-1, keepdims=True)
    e = jnp.exp(s4 - m)
    denom = jnp.sum(e, axis=-1, keepdims=True)
    p4 = e * pl.reciprocal(denom, approx=True)         # divide -> EUP reciprocal
    p = p4.reshape(cb, G, NH * G)                      # (cb, G, NH*G) f32

    # Attention output, already laid out as (chunk, g, n*E + h*D + d).
    o = jnp.einsum("cgj,cjx->cgx", p.astype(v2.dtype), v2,
                   preferred_element_type=jnp.float32)  # (cb, G, NE) f32

    # Fused output projection: rows are (g, n) pairs of width E.
    o2 = o.reshape(cb * G * N, E).astype(wo_ref.dtype)
    y = jnp.dot(o2, wo_ref[...], preferred_element_type=jnp.float32) + bo_ref[...]
    y_ref[...] = y.reshape(cb, G, NE)

    # Head-averaged attention weights via a constant (1/H) selector matmul
    # (keeps the head reduction on the MXU, no strided reshuffle / mean).
    r_row = jax.lax.broadcasted_iota(jnp.int32, (NH * G, N * G), 0)
    r_col = jax.lax.broadcasted_iota(jnp.int32, (NH * G, N * G), 1)
    r_sel = jnp.where((r_row // (H * G) == r_col // G) & (r_row % G == r_col % G),
                      jnp.float32(1.0 / H), jnp.float32(0.0))     # (NH*G, N*G)
    w_ref[...] = jnp.dot(p.reshape(cb * G, NH * G), r_sel,
                         preferred_element_type=jnp.float32).reshape(cb, G, N * G)


def grouped_attention_outproj(qkv, wo_t, bo, *, batch, heads, head_dim):
    _, n_chunks, G, NE = qkv.shape
    N, H, D = batch, heads, head_dim
    E = H * D

    # Chunks per grid step: amortize the ~0.35us per-step overhead, but keep at
    # least 2 parallel steps so both v7x TensorCores get work, and cap the
    # per-step VMEM footprint.
    cb = 1
    max_bytes = 2 * 1024 * 1024
    for cand in range(1, n_chunks + 1):
        if n_chunks % cand or (n_chunks // cand) < min(2, n_chunks):
            continue
        if cand * G * NE * 2 * 8 <= max_bytes:
            cb = cand
    grid = (n_chunks // cb,)

    kern = functools.partial(_attn_kernel, batch=N, heads=H, groups=G,
                             head_dim=D, cb=cb)
    return pl.pallas_call(
        kern,
        grid=grid,
        in_specs=[
            pl.BlockSpec((3, cb, G, NE), lambda c: (0, c, 0, 0)),
            pl.BlockSpec((E, E), lambda c: (0, 0)),
            pl.BlockSpec((1, E), lambda c: (0, 0)),
        ],
        out_specs=(
            pl.BlockSpec((cb, G, NE), lambda c: (c, 0, 0)),
            pl.BlockSpec((cb, G, N * G), lambda c: (c, 0, 0)),
        ),
        out_shape=(
            jax.ShapeDtypeStruct((n_chunks, G, NE), jnp.float32),
            jax.ShapeDtypeStruct((n_chunks, G, N * G), jnp.float32),
        ),
        compiler_params=pltpu.CompilerParams(
            dimension_semantics=("parallel",),
            vmem_limit_bytes=_VMEM_LIMIT,
        ),
    )(qkv, wo_t, bo)


# ------------------------------ Module wrapper ------------------------------ #

class GroupQueryAttention:
    def __init__(self, n_heads, n_emb, n_ctx, num_groups=8, dropout=0.1, *, key):
        assert n_emb % n_heads == 0
        self.n_heads = n_heads
        self.n_emb = n_emb
        self.n_ctx = n_ctx
        self.num_groups = num_groups
        self.head_dim = n_emb // n_heads
        k1, k2, k3, k4 = jax.random.split(key, 4)
        bound = 1.0 / math.sqrt(n_emb)
        # Deterministic synthetic init (uniform, nn.MultiheadAttention-style shapes).
        self.in_proj_weight = jax.random.uniform(k1, (3 * n_emb, n_emb), jnp.float32, -bound, bound)
        self.in_proj_bias = jax.random.uniform(k2, (3 * n_emb,), jnp.float32, -bound, bound)
        self.out_proj_weight = jax.random.uniform(k3, (n_emb, n_emb), jnp.float32, -bound, bound)
        self.out_proj_bias = jax.random.uniform(k4, (n_emb,), jnp.float32, -bound, bound)

        E = n_emb
        # Kernel-ready parameters: bf16 transposed weights for the MXU, f32 biases
        # folded into the matmul epilogues (no per-call transposes / casts).
        self._wqkv_t = jnp.transpose(self.in_proj_weight.reshape(3, E, E), (0, 2, 1)).astype(jnp.bfloat16)
        self._bqkv = self.in_proj_bias.reshape(3, 1, E).astype(jnp.float32)
        self._wo_t = self.out_proj_weight.T.astype(jnp.bfloat16)
        self._bo = self.out_proj_bias.reshape(1, E).astype(jnp.float32)
        # TODO(synk): dropout (attn-weight dropout inside MultiheadAttention and the
        # output nn.Dropout) is implemented as eval-mode identity; torch's stateful
        # RNG dropout has no deterministic Pallas equivalent.

    def __call__(self, q, k, v):
        L, N, E = q.shape
        G, H, D = self.num_groups, self.n_heads, self.head_dim
        assert L % G == 0, "sequence length must be a multiple of num_groups"
        n_chunks = L // G

        # --- kernel 1: all three projections in one tiled bf16 matmul ---
        x3 = jnp.stack([q, k, v], axis=0).astype(jnp.bfloat16).reshape(3, L * N, E)
        qkv = fused_qkv_projection(x3, self._wqkv_t, self._bqkv)        # (3, L*N, E) bf16

        # Contiguous (free) reshape into the chunked, lane-dense layout.
        qkv = qkv.reshape(3, n_chunks, G, N * E)

        # --- kernel 2: per-chunk attention + head-mean weights + out-projection ---
        y, w = grouped_attention_outproj(qkv, self._wo_t, self._bo,
                                         batch=N, heads=H, head_dim=D)

        x_out = y.reshape(L, N, E)                                      # contiguous
        # (n_chunks, G, N, G) -> (n_chunks*N, G, G): tiny tensor, host-side reorder.
        attn_weights = jnp.transpose(w.reshape(n_chunks, G, N, G), (0, 2, 1, 3))
        attn_weights = attn_weights.reshape(n_chunks * N, G, G)
        # NOTE: the reference module's `torch.cat(x, dim=0)` on a single Tensor is a
        # bug; the clearly-intended concat of per-group attention outputs is used here.
        return x_out, attn_weights


# ------------------------------ Pure-JAX check ------------------------------ #

def reference(mod, q, k, v):
    L, N, E = q.shape
    G, H, D = mod.num_groups, mod.n_heads, mod.head_dim
    wq, wk, wv = jnp.split(mod.in_proj_weight, 3, axis=0)
    bq, bk, bv = jnp.split(mod.in_proj_bias, 3)
    outs, weights = [], []
    for s in range(0, L, G):
        qg = q[s:s + G] @ wq.T + bq
        kg = k[s:s + G] @ wk.T + bk
        vg = v[s:s + G] @ wv.T + bv

        def heads(x):
            return jnp.transpose(x.reshape(G, N, H, D), (1, 2, 0, 3))  # (N,H,G,D)

        qh, kh, vh = heads(qg), heads(kg), heads(vg)
        sc = jnp.einsum("nhqd,nhkd->nhqk", qh, kh) / math.sqrt(D)
        p = jax.nn.softmax(sc, axis=-1)
        o = jnp.einsum("nhqk,nhkd->nhqd", p, vh)
        o = jnp.transpose(o, (2, 0, 1, 3)).reshape(G, N, E)
        o = o @ mod.out_proj_weight.T + mod.out_proj_bias
        outs.append(o)
        weights.append(jnp.mean(p, axis=1))
    return jnp.concatenate(outs, axis=0), jnp.concatenate(weights, axis=0)


if __name__ == "__main__":
    key = jax.random.PRNGKey(0)
    kparam, kq, kk, kv = jax.random.split(key, 4)

    n_heads, n_emb, n_ctx, num_groups = 4, 32, 16, 8
    L, N = 16, 2  # seq_len, batch

    mod = GroupQueryAttention(n_heads, n_emb, n_ctx, num_groups, key=kparam)
    q = jax.random.normal(kq, (L, N, n_emb), jnp.float32)
    k = jax.random.normal(kk, (L, N, n_emb), jnp.float32)
    v = jax.random.normal(kv, (L, N, n_emb), jnp.float32)

    x, w = mod(q, k, v)
    jax.block_until_ready((x, w))

    xr, wr = reference(mod, q, k, v)
    assert x.shape == (L, N, n_emb)
    assert w.shape == ((L // num_groups) * N, num_groups, num_groups)
    # bf16 matmuls + approx reciprocal -> slightly looser tolerance than pure f32.
    assert jnp.allclose(x, xr, atol=5e-2), float(jnp.max(jnp.abs(x - xr)))
    assert jnp.allclose(w, wr, atol=2e-2), float(jnp.max(jnp.abs(w - wr)))

    print("KERNEL_OK")
</pallas_src>

<mosaic_0001>
module attributes {stable_mosaic.version = 11 : i64} {
  func.func @_proj_kernel(%arg0: i32, %arg1: i32, %arg2: i32, %arg3: i32, %arg4: memref<1x32x32xbf16, #tpu.memory_space<vmem>>, %arg5: memref<1x32x32xbf16, #tpu.memory_space<vmem>>, %arg6: memref<1x1x32xf32, #tpu.memory_space<vmem>>, %arg7: memref<1x32x32xbf16, #tpu.memory_space<vmem>>, %arg8: memref<32x32xf32, #tpu.memory_space<vmem>>) attributes {dimension_semantics = [#tpu.dimension_semantics<parallel>, #tpu.dimension_semantics<parallel>, #tpu.dimension_semantics<parallel>, #tpu.dimension_semantics<arbitrary>], iteration_bounds = array<i64: 3, 1, 1, 1>, scalar_prefetch = 0 : i64, scratch_operands = 1 : i64, tpu.core_type = #tpu.core_type<tc>, window_params = [{transform_indices = @transform_0, window_bounds = array<i64: 1, 32, 32>}, {transform_indices = @transform_1, window_bounds = array<i64: 1, 32, 32>}, {transform_indices = @transform_2, window_bounds = array<i64: 1, 1, 32>}, {transform_indices = @transform_3, window_bounds = array<i64: 1, 32, 32>}]} {
    %c0_i32 = arith.constant 0 : i32
    %0 = arith.cmpi eq, %arg3, %c0_i32 : i32
    %1 = arith.extui %0 : i1 to i32
    %c0_i32_0 = arith.constant 0 : i32
    %2 = arith.cmpi ne, %1, %c0_i32_0 : i32
    scf.if %2 {
      %cst_12 = arith.constant 0.000000e+00 : f32
      %14 = vector.broadcast %cst_12 : f32 to vector<32x32xf32>
      %c0_13 = arith.constant 0 : index
      %c0_14 = arith.constant 0 : index
      %15 = vector.load %arg8[%c0_13, %c0_14] : memref<32x32xf32, #tpu.memory_space<vmem>>, vector<32x32xf32>
      tpu.vector_store %arg8[%c0_13, %c0_14], %14 {strides = array<i32>} : memref<32x32xf32, #tpu.memory_space<vmem>>, vector<32x32xf32>,
    } else {
    }
    %c0 = arith.constant 0 : index
    %c0_1 = arith.constant 0 : index
    %3 = vector.load %arg8[%c0, %c0_1] : memref<32x32xf32, #tpu.memory_space<vmem>>, vector<32x32xf32>
    %c0_2 = arith.constant 0 : index
    %c0_3 = arith.constant 0 : index
    %c0_4 = arith.constant 0 : index
    %4 = vector.load %arg4[%c0_2, %c0_3, %c0_4] : memref<1x32x32xbf16, #tpu.memory_space<vmem>>, vector<1x32x32xbf16>
    %5 = vector.shape_cast %4 : vector<1x32x32xbf16> to vector<32x32xbf16>
    %c0_5 = arith.constant 0 : index
    %c0_6 = arith.constant 0 : index
    %c0_7 = arith.constant 0 : index
    %6 = vector.load %arg5[%c0_5, %c0_6, %c0_7] : memref<1x32x32xbf16, #tpu.memory_space<vmem>>, vector<1x32x32xbf16>
    %7 = vector.shape_cast %6 : vector<1x32x32xbf16> to vector<32x32xbf16>
    %cst = arith.constant dense<0.000000e+00> : vector<32x32xf32>
    %8 = tpu.matmul %5, %7, %cst {dimension_numbers = #tpu.dot_dimension_numbers<[1], [0], [0], [1], [0, 0, 1, 1], [], []>} : vector<32x32xbf16>, vector<32x32xbf16>, vector<32x32xf32> -> vector<32x32xf32>
    %9 = arith.addf %3, %8 : vector<32x32xf32>
    %c0_8 = arith.constant 0 : index
    %c0_9 = arith.constant 0 : index
    %10 = vector.load %arg8[%c0_8, %c0_9] : memref<32x32xf32, #tpu.memory_space<vmem>>, vector<32x32xf32>
    tpu.vector_store %arg8[%c0_8, %c0_9], %9 {strides = array<i32>} : memref<32x32xf32, #tpu.memory_space<vmem>>, vector<32x32xf32>,
    %c0_i32_10 = arith.constant 0 : i32
    %11 = arith.cmpi eq, %arg3, %c0_i32_10 : i32
    %12 = arith.extui %11 : i1 to i32
    %c0_i32_11 = arith.constant 0 : i32
    %13 = arith.cmpi ne, %12, %c0_i32_11 : i32
    scf.if %13 {
      %c0_12 = arith.constant 0 : index
      %c0_13 = arith.constant 0 : index
      %14 = vector.load %arg8[%c0_12, %c0_13] : memref<32x32xf32, #tpu.memory_space<vmem>>, vector<32x32xf32>
      %c0_14 = arith.constant 0 : index
      %c0_15 = arith.constant 0 : index
      %c0_16 = arith.constant 0 : index
      %15 = vector.load %arg6[%c0_14, %c0_15, %c0_16] : memref<1x1x32xf32, #tpu.memory_space<vmem>>, vector<1x1x32xf32>
      %16 = vector.shape_cast %15 : vector<1x1x32xf32> to vector<1x32xf32>
      %17 = vector.broadcast %16 : vector<1x32xf32> to vector<32x32xf32>
      %18 = arith.addf %14, %17 : vector<32x32xf32>
      %19 = arith.truncf %18 : vector<32x32xf32> to vector<32x32xbf16>
      %c0_17 = arith.constant 0 : index
      %c0_18 = arith.constant 0 : index
      %c0_19 = arith.constant 0 : index
      %20 = vector.load %arg7[%c0_17, %c0_18, %c0_19] : memref<1x32x32xbf16, #tpu.memory_space<vmem>>, vector<1x32x32xbf16>
      %21 = vector.shape_cast %20 : vector<1x32x32xbf16> to vector<32x32xbf16>
      %22 = vector.shape_cast %19 : vector<32x32xbf16> to vector<1x32x32xbf16>
      tpu.vector_store %arg7[%c0_17, %c0_18, %c0_19], %22 {strides = array<i32>} : memref<1x32x32xbf16, #tpu.memory_space<vmem>>, vector<1x32x32xbf16>,
    } else {
    }
    return
  }
  func.func @transform_0(%arg0: i32, %arg1: i32, %arg2: i32, %arg3: i32) -> (i32, i32, i32) {
    %c0_i32 = arith.constant 0 : i32
    return %arg0, %arg1, %arg3 : i32, i32, i32
  }
  func.func @transform_1(%arg0: i32, %arg1: i32, %arg2: i32, %arg3: i32) -> (i32, i32, i32) {
    %c0_i32 = arith.constant 0 : i32
    return %arg0, %arg3, %arg2 : i32, i32, i32
  }
  func.func @transform_2(%arg0: i32, %arg1: i32, %arg2: i32, %arg3: i32) -> (i32, i32, i32) {
    %c0_i32 = arith.constant 0 : i32
    %c0_i32_0 = arith.constant 0 : i32
    return %arg0, %c0_i32, %arg2 : i32, i32, i32
  }
  func.func @transform_3(%arg0: i32, %arg1: i32, %arg2: i32, %arg3: i32) -> (i32, i32, i32) {
    %c0_i32 = arith.constant 0 : i32
    return %arg0, %arg1, %arg2 : i32, i32, i32
  }
}

</mosaic_0001>

<bundles_post_ra>
// kernel: tpu_custom_call.1
= control target key start
LH: loop header
LB: loop body
LE: loop exit
PB: predicated region body
PF: predicated region fallthrough
CT: control target
= control target key end

     0   :  { %s1078_s0 = inlined_call_operand.hbm [shape: bf16[3,32,32], index: 0, kind: input, shape index: {}]   ;;  %s1079_s1 = inlined_call_operand.hbm [shape: bf16[3,32,32], index: 1, kind: input, shape index: {}]   ;;  %s1080_s2 = inlined_call_operand.hbm [shape: f32[3,1,32], index: 2, kind: input, shape index: {}]   ;;  %s1081_s3 = inlined_call_operand.hbm [shape: bf16[3,32,32], index: 3, kind: output, shape index: {}]  }
   0x1   :  { %1086 = sst [smem:[#allocation18_spill]] %s1079_s1 }
   0x2   :  { %8 = vsyncpa [#allocation4], 0 }
   0x3   :  { %10 = vsyncpa [#allocation4 + $0x1], 0 }
   0x4   :  { %11 = vsyncpa [#allocation7], 0 }
   0x5   :  { %13 = vsyncpa [#allocation7 + $0x1], 0 }
   0x6   :  { %14 = vsyncpa [#allocation5], 0 }
   0x7   :  { %16 = vsyncpa [#allocation5 + $0x1], 0  ;;  %s902_s12 = smov 0   ;;  %s904_s13 = smov 0  }
   0x8   :  { %s906_s14 = smov 0   ;;  %s908_s15 = smov 0  }
   0x9   :  { %s910_s16 = smov 0   ;;  %s912_s17 = smov 0  }
   0xa LB: > { %1087 = sst [smem:[#allocation13_spill]] %s855_s12  ;;  %s933_s18 = sadd.s32 4294967295, %s875_s17   ;;  %s875_s17 = sphi %s912_s17, %s22_s17   ;;  %s871_s16 = sphi %s910_s16, %s1108_s16   ;;  %s867_s15 = sphi %s908_s15, %s1107_s15   ;;  %s863_s14 = sphi %s906_s14, %s1106_s14   ;;  %s859_s13 = sphi %s904_s13, %s1105_s13   ;;  %s855_s12 = sphi %s902_s12, %s1104_s12  }
   0xb   : > { %1088 = sst [smem:[#allocation14_spill]] %s863_s14  ;;  %s576_s19 = sadd.s32 4294967294, %s875_s17  }
   0xc   : > { %s48_s20 = sadd.s32 1, %s871_s16  ;;  %s59_s21 = sadd.s32 1, %s863_s14 }
   0xd   : > { %p50_p0 = scmp.ge.s32.totalorder %s48_s20, 3  ;;  %p66_p1 = scmp.ne.s32.totalorder %s863_s14, %s859_s13 }
   0xe   : > { %p67_p2 = scmp.eq.s32.totalorder %s875_s17, 0  ;;  %p72_p3 = scmp.ne.s32.totalorder %s859_s13, %s855_s12 }
   0xf   : > { %s1110_s20 = smov (%p50_p0, %s48_s20), 0  ;;  %p73_p5 = scmp.eq.s32.totalorder %s933_s18, 0 }
  0x10   : > { %1089 = sst [smem:[#allocation15_spill]] %s1110_s20  ;;  %p945_p4 = por %p67_p2, %p66_p1 }
  0x11   : > { %s52_s23 = ssub.s32 %s871_s16, %s1110_s20  ;;  %p158_p6 = scmp.eq.s32.totalorder %s933_s18, 2 }
  0x12   : > { %p57_p7 = scmp.eq.s32.totalorder %s52_s23, 0  ;;  %p953_p8 = por %p73_p5, %p72_p3 }
  0x13   : > { %p957_p9 = por %p158_p6, %p66_p1  ;;  %p164_p10 = scmp.eq.s32.totalorder %s576_s19, 2 }
  0x14   : > { %s962_s26 = scalar_select %p57_p7, %s863_s14, %s59_s21  }
  0x15   : > { %p964_p11 = por %p164_p10, %p72_p3  ;;  %p643_p12 = scmp.lt.s32.totalorder %s875_s17, 3 }
  0x16   : > { %1093 = sst [smem:[#allocation16_spill]] %s962_s26  ;;  %s970_s28 = sand.u32 1, %s863_s14  }
  0x17   : > { %s1094_s27 = scalar_select %p964_p11, 1, 0 }
  0x18   : > { %s579_s29 = sshll.u32 %s970_s28, 4  ;;  %s612_s30 = sshll.u32 %s871_s16, 4 }
  0x19   : > { %1095 = sst [smem:[#allocation17_spill]] %s1094_s27  ;;  %p976_p13 = pnand %p643_p12, %p945_p4 }
  0x1a   : > { %s209_s5 = sand.u32 1, %s875_s17   ;;  %s1097_s1 = sld [smem:[#allocation18_spill]] }
  0x1b   : > { %s213_s10 = scalar_lea.vmem [#allocation6], %s579_s29  ;;  %s210_s19 = scalar_lea.sflag [#allocation7], %s209_s5 }
  0x1c   : > { %s224_s11 = sshll.u32 %s213_s10, 4  ;;  %s877_s21 = smov 64   ;;  %s225_s11 = int_to_ptr.vmem [resolvable:$true] %s224_s11 }
  0x1d   : > { %s878_s22 = smov 4   ;;  %p585_p0 = scmp.ge.s32.totalorder %s875_s17, 1 }
  0x1e   : > { %p250_p1 = scmp.lt.s32.totalorder %s875_s17, 4  ;;  %s185_s5 = scalar_lea.sflag [#allocation4], %s970_s28 }
  0x1f   : > { %s241_s26 = scalar_lea.hbm %s1080_s2, %s871_s16  ;;  %s237_s27 = scalar_lea.vmem [#allocation8], %s970_s28 }
  0x20   : > { %s221_s8 = scalar_lea.hbm %s1097_s1, %s612_s30  ;;  %p988_p2 = pnand %p585_p0, %p250_p1 }
  0x21   : > { %s222_s9 = sshll.u32 %s221_s8, 4  ;;  %s196_s8 = scalar_lea.hbm %s1078_s0, %s612_s30  ;;  %s223_s9 = int_to_ptr.hbm [resolvable:$true] %s222_s9 }
  0x22   : > { %635 = dma.hbm_to_vmem [thread:$0]  (!%p976_p13), %s223_s9, 256, %s225_s11, %s210_s19, %s877_s21, %s877_s21, %s878_s22  }
  0x23   : > { %s197_s10 = sshll.u32 %s196_s8, 4  ;;  %s188_s1 = scalar_lea.vmem [#allocation3], %s579_s29  ;;  %s198_s10 = int_to_ptr.hbm [resolvable:$true] %s197_s10 }
  0x24   : > { %s199_s20 = sshll.u32 %s188_s1, 4  ;;  %s243_s14 = sshll.u32 %s241_s26, 4  ;;  %s200_s20 = int_to_ptr.vmem [resolvable:$true] %s199_s20  ;;  %s244_s14 = int_to_ptr.hbm [resolvable:$true] %s243_s14 }
  0x25   : > { %632 = dma.hbm_to_vmem [thread:$0]  (!%p976_p13), %s198_s10, 256, %s200_s20, %s185_s5, %s877_s21, %s877_s21, %s878_s22  }
  0x26   : > { %s245_s12 = sshll.u32 %s237_s27, 4  ;;  %254 = sbr.rel (%p988_p2) target bundleno = 208 (0xd0), region = 32  ;;  %s246_s12 = int_to_ptr.vmem [resolvable:$true] %s245_s12 }
  0x27   : > { %638 = dma.hbm_to_vmem [thread:$0]  (!%p976_p13), %s244_s14, 16, %s246_s12, %s210_s19  }
  0x28   : > { %s1008_s1 = sand.u32 (!%p988_p2), 1, %s859_s13  }
  0x29   : > { %s1011_s20 = sshll.u32 (!%p988_p2), %s1008_s1, 4  ;;  %s257_s29 = scalar_lea.sflag (!%p988_p2), [#allocation4], %s1008_s1 }
  0x2a   : > { %s260_s26 = scalar_lea.vmem (!%p988_p2), [#allocation3], %s1011_s20 }
  0x2b   : > { %842 = dma.done.wait (%p953_p8), %s257_s29, 256  }
  0x2c   : > { %844 = vsyncadd (%p953_p8), %s257_s29, 4294967040  ;;  %s266_s12 = sand.u32 1, %s933_s18   ;;  %s270_s27 = scalar_lea.vmem [#allocation6], %s1011_s20 }
  0x2d   : > { %s267_s14 = scalar_lea.sflag [#allocation7], %s266_s12 }
  0x2e   : > { %846 = dma.done.wait (%p953_p8), %s267_s14, 272  }
  0x2f   : > { %848 = vsyncadd (%p953_p8), %s267_s14, 4294967024  ;;  %vm320_vm0 = vcmask 261120   ;;  %v879_v0 = vmov 0.0   ;;  %v617_v1 = vld [vmem:[%s270_s27 + $0x8] sm:$0xff]  ;;  %v616_v2 = vld [vmem:[%s270_s27] sm:$0xff]  ;;  %s279_s18 = scalar_lea.vmem [#allocation8], %s1008_s1 }
  0x30   : > { %321 = vst.msk [vmem:[#allocation2] sm:$0xff] %vm320_vm0, %v879_v0  ;;  %372 = vmatpush.bf16.msra.mxu0 %v617_v1  ;;  %619 = vmatpush.bf16.msra.mxu1 %v617_v1  ;;  %v614_v3 = vld [vmem:[%s260_s26] sm:$0xff]  ;;  %v615_v4 = vld [vmem:[%s260_s26 + $0x8] sm:$0xff]  ;;  %vm412_vm1 = vcmask 257024   ;;  %s618_s24 = sshll.u32 %s867_s15, 4  ;;  %s311_s28 = scalar_lea.vmem [#allocation9], %s1011_s20 }
  0x31   : > { %322 = vst.msk [vmem:[#allocation2 + $0x8] sm:$0xff] %vm320_vm0, %v879_v0  ;;  %v698_v13 = vld [vmem:[%s279_s18] ss:$0 sm:$0xff]  ;;  %s432_s19 = scalar_lea.hbm %s1081_s3, %s618_s24  ;;  %s433_s21 = sshll.u32 %s311_s28, 4  ;;  %s434_s21 = int_to_ptr.vmem [resolvable:$true] %s433_s21 }
  0x32   : > { %323 = vst.msk [vmem:[#allocation2 + $0x10] sm:$0xff] %vm320_vm0, %v879_v0  ;;  %s435_s22 = sshll.u32 %s432_s19, 4  ;;  %s418_s15 = scalar_lea.sflag [#allocation5], %s1008_s1  ;;  %s436_s22 = int_to_ptr.hbm [resolvable:$true] %s435_s22 }
  0x33   : > { %324 = vst.msk [vmem:[#allocation2 + $0x18] sm:$0xff] %vm320_vm0, %v879_v0  ;;  %s803_s23 = sshra.s32 %s436_s22, 4  ;;  %s809_s10 = scalar_lea.hbm %s1081_s3, 48  ;;  %s804_s23 = int_to_ptr.hbm [resolvable:$true] %s803_s23 }
  0x34   : > { %373 = vmatpush.bf16.msra.mxu0 %v616_v2  ;;  %620 = vmatpush.bf16.msra.mxu1 %v616_v2  ;;  %s805_s6 = scalar_lea.hbm %s804_s23, 16  ;;  %p810_p6 = scmp.lt.s32.totalorder %s804_s23, %s1081_s3 }
  0x35   : > { %p806_p3 = scmp.ne.s32.totalorder %s804_s23, %s805_s6  ;;  %p811_p7 = scmp.lt.s32.totalorder %s809_s10, %s805_s6 }
  0x37   : > { %605 = vmatmul.msk.bf16.vlgmr.msra.gmra.mxu0 %vm320_vm0, %v614_v3  ;;  %606 = vmatmul.msk.bf16.vlgmr.msra.gmra.mxu1 %vm320_vm0, %v615_v4  ;;  %v325_v5 = vld [vmem:[#allocation2] sm:$0xff]  ;;  %p807_p4 = pnand %p806_p3, %p957_p9  ;;  %p812_p8 = por %p811_p7, %p810_p6 }
  0x38   : > { %v326_v11 = vld [vmem:[#allocation2 + $0x8] sm:$0xff] }
  0x39   : > { %v327_v6 = vld [vmem:[#allocation2 + $0x10] sm:$0xff]  ;;  %p808_p5 = pneg %p807_p4 }
  0x3a   : > { %v328_v12 = vld [vmem:[#allocation2 + $0x18] sm:$0xff] }
  0x3b   : > { %p813_p10 = pnand %p812_p8, %p808_p5 }
  0xb4   : > { %v375_v7 = vpop.f32.mrf.mxu0  ;;  %v380_v8 = vpop.f32.mrf.mxu1 }
  0xb5   : > { %v385_v9 = vadd.f32 %v375_v7, %v325_v5  ;;  %v387_v10 = vadd.f32 %v380_v8, %v327_v6 }
  0xb7   : > { %389 = vst.msk [vmem:[#allocation2] sm:$0xff] %vm320_vm0, %v385_v9 }
  0xb8   : > { %391 = vst.msk [vmem:[#allocation2 + $0x10] sm:$0xff] %vm320_vm0, %v387_v10 }
  0xbc   : > { %v377_v14 = vpop.f32.mrf.mxu0  ;;  %v382_v15 = vpop.f32.mrf.mxu1 }
  0xbd   : > { %v386_v16 = vadd.f32 %v377_v14, %v326_v11  ;;  %v388_v17 = vadd.f32 %v382_v15, %v328_v12 }
  0xbe   : > { %v396_v18 = vld [vmem:[#allocation2] sm:$0xff] }
  0xbf   : > { %390 = vst.msk [vmem:[#allocation2 + $0x8] sm:$0xff] %vm320_vm0, %v386_v16  ;;  %v398_v19 = vld [vmem:[#allocation2 + $0x10] sm:$0xff]  ;;  %v404_v20 = vadd.f32 %v698_v13, %v396_v18 }
  0xc0   : > { %392 = vst.msk [vmem:[#allocation2 + $0x18] sm:$0xff] %vm320_vm0, %v388_v17  ;;  %v406_v21 = vadd.f32 %v698_v13, %v398_v19 }
  0xc1   : > { %v408_v22 = vpack.c.bf16 %v404_v20, %v404_v20 }
  0xc2   : > { %v410_v23 = vpack.c.bf16 %v406_v21, %v406_v21 }
  0xc3   : > { %413 = vst.msk [vmem:[%s311_s28] sm:$0xf] %vm412_vm1, %v408_v22 }
  0xc4   : > { %415 = vst.msk [vmem:[%s311_s28 + $0x8] sm:$0xf] %vm412_vm1, %v410_v23 }
  0xc6   : > { %v397_v24 = vld [vmem:[#allocation2 + $0x8] sm:$0xff] }
  0xc7   : > { %v399_v25 = vld [vmem:[#allocation2 + $0x18] sm:$0xff]  ;;  %v405_v26 = vadd.f32 %v698_v13, %v397_v24 }
  0xc8   : > { %v407_v27 = vadd.f32 %v698_v13, %v399_v25 }
  0xc9   : > { %v409_v28 = vpack.c.bf16 %v405_v26, %v405_v26 }
  0xca   : > { %v411_v29 = vpack.c.bf16 %v407_v27, %v407_v27 }
  0xcb   : > { %414 = vst.msk [vmem:[%s311_s28 + $0x4] sm:$0xf] %vm412_vm1, %v409_v28 }
  0xcc   : > { %416 = vst.msk [vmem:[%s311_s28 + $0xc] sm:$0xf] %vm412_vm1, %v411_v29 }
  0xcd   : > { %816 = shalt.err (!%p813_p10)
}
  0xce   : > { %s880_s11 = smov 64   ;;  %s881_s1 = smov 4  }
  0xcf   : > { %627 = dma.vmem_to_hbm [thread:$0]  (%p957_p9), %s434_s21, 256, %s436_s22, %s418_s15, %s880_s11, %s880_s11, %s881_s1  }
  0xd0 PF: > { %s1099_s20 = sld [smem:[#allocation13_spill]]  ;;  %p644_p12 = scmp.ge.s32.totalorder %s875_s17, 2 }
  0xd2   : > { %p640_p13 = pnand %p644_p12, %p964_p11 }
  0xd4   : > { %p641_p0 = pneg %p640_p13 }
  0xd6   : > { %s450_s26 = sand.u32 1, %s1099_s20  }
  0xd7   : > { %s451_s12 = scalar_lea.sflag [#allocation5], %s450_s26 }
  0xd8   : > { %850 = dma.done.wait (%p641_p0), %s451_s12, 256  }
  0xd9   : > { %852 = vsyncadd (%p641_p0), %s451_s12, 4294967040  ;;  %s22_s17 = sadd.s32 1, %s875_s17   ;;  %s1101_s14 = sld [smem:[#allocation14_spill]] }
  0xda   : > { %p19_p1 = scmp.ge.s32.totalorder %s22_s17, 5   ;;  %s1102_s27 = sld [smem:[#allocation16_spill]] }
  0xdb   : > { %s1103_s25 = sld [smem:[#allocation15_spill]]  ;;  %s1104_s12 = smov %s859_s13 }
  0xdc   : > { %s1107_s15 = smov %s871_s16 }
  0xdd   :  { %21 = sbr.rel (!%p19_p1) target bundleno = 10 (0xa), region = 109 }
  0xdf   : > { %s1105_s13 = smov %s1101_s14 }
  0xe0   : > { %s1106_s14 = smov %s1102_s27 }
  0xe1   : > { %s1108_s16 = smov %s1103_s25 }
  0xe2   :  { %457 = vsyncpa [#allocation4], 1 }
  0xe3   :  { %459 = vsyncpa [#allocation4 + $0x1], 1 }
  0xe4   :  { %460 = vsyncpa [#allocation7], 1 }
  0xe5   :  { %462 = vsyncpa [#allocation7 + $0x1], 1 }
  0xe6   :  { %463 = vsyncpa [#allocation5], 1 }
  0xe7   :  { %465 = vsyncpa [#allocation5 + $0x1], 1 }

</bundles_post_ra>
